<compile_context>
chip_gen: v6e
topology: v6e:2x2x1
jax: 0.10.0
libtpu: 0.0.40
codegen_flags: <defaults>
</compile_context>

<pallas_src>
import jax
import jax.numpy as jnp
from jax.experimental import pallas as pl
from jax.experimental.pallas import tpu as pltpu

HIGH = jax.lax.Precision.HIGHEST  # used only by the pure-JAX reference


def _attention_kernel(xq_ref, xp_ref, wf_ref, wh_ref, wg_ref, wo_ref, gamma_ref,
                      out_ref, phi_p_ref, g_p_ref):
    """Grid = (B, N // TQ).

    xq_ref   : (TQ, C)       f32   query tile of tokens (also the residual input)
    xp_ref   : (4*N/4, C)    bf16  full image in 2x2-pool-block layout (per batch)
                                   row index = block_pos * (N/4) + pooled_token
    wf/wh    : (C, C/8)      bf16  ; wg: (C, C/2) ; wo: (C/2, C)
    gamma_ref: (1,)          f32   in SMEM
    scratch  : phi_p (N/4, C/8) bf16, g_p (N/4, C/2) bf16 — cached per batch
    """
    q = pl.program_id(1)
    npool = phi_p_ref.shape[0]   # N/4
    cf = phi_p_ref.shape[1]      # C/8
    cg = g_p_ref.shape[1]        # C/2

    # ---- once per batch element: compacted pooled keys / values --------------
    @pl.when(q == 0)
    def _():
        xp = xp_ref[...]                                               # (4*N/4, C)
        # 1x1 conv is per-pixel, so maxpool2x2(conv(x)) == max over the four
        # per-position projections of the 2x2 block layout.  One stacked matmul
        # per weight, then a VPU max over the leading block axis; output is
        # already compacted to N/4 pooled tokens in row-major (H/2, W/2) order.
        ph = jnp.dot(xp, wh_ref[...], preferred_element_type=jnp.float32)
        gg = jnp.dot(xp, wg_ref[...], preferred_element_type=jnp.float32)
        phi = jnp.max(ph.reshape(4, npool, cf), axis=0)                # (N/4, C/8)
        g = jnp.max(gg.reshape(4, npool, cg), axis=0)                  # (N/4, C/2)
        phi_p_ref[...] = phi.astype(jnp.bfloat16)
        g_p_ref[...] = g.astype(jnp.bfloat16)

    # ---- per query tile -------------------------------------------------------
    xq = xq_ref[...]                                                   # (TQ, C) f32
    theta = jnp.dot(xq.astype(jnp.bfloat16), wf_ref[...],
                    preferred_element_type=jnp.float32)                # (TQ, C/8)

    # scores against the compacted pooled keys: (TQ, N/4)
    s = jax.lax.dot_general(theta.astype(jnp.bfloat16), phi_p_ref[...],
                            (((1,), (1,)), ((), ())),
                            preferred_element_type=jnp.float32)
    s = s - jnp.max(s, axis=-1, keepdims=True)
    e = jnp.exp(s)
    denom = jnp.sum(e, axis=-1, keepdims=True)                         # (TQ, 1)

    # deferred softmax normalization: (e @ g_p) * (1/denom)
    attn_g = jnp.dot(e.astype(jnp.bfloat16), g_p_ref[...],
                     preferred_element_type=jnp.float32)               # (TQ, C/2)
    attn_g = attn_g * pl.reciprocal(denom, approx=True)

    o = jnp.dot(attn_g.astype(jnp.bfloat16), wo_ref[...],
                preferred_element_type=jnp.float32)                    # (TQ, C)

    out_ref[...] = xq + gamma_ref[0] * o


def _pick_tq(n):
    for t in (512, 256, 128, 64):
        if n >= t and n % t == 0:
            return t
    return n


def attention_block(x_nchw, w_f, w_g, w_h, w_o, gamma):
    """x_nchw: (B, C, H, W).  Weight shapes as in the PyTorch module:
    w_f:(C/8,C)  w_g:(C/2,C)  w_h:(C/8,C)  w_o:(C,C/2)  gamma: scalar."""
    B, C, H, W = x_nchw.shape
    assert H % 2 == 0 and W % 2 == 0, "2x2 max-pool requires even H and W"
    N = H * W
    NP = N // 4
    Cf = w_f.shape[0]
    Cg = w_g.shape[0]
    TQ = _pick_tq(N)
    num_q = N // TQ

    # Token-major view (for theta / residual / output) ...
    x_hwc = jnp.transpose(x_nchw, (0, 2, 3, 1)).astype(jnp.float32)      # (B,H,W,C)
    x_tok = x_hwc.reshape(B, N, C)                                       # (B,N,C)
    # ... and the 2x2-pool-block layout (for the pooled key/value projections):
    # x_pool[b, (dy*2+dx)*NP + i*(W/2)+j, :] = x[b, :, 2i+dy, 2j+dx]
    x_pool = jnp.transpose(
        x_hwc.reshape(B, H // 2, 2, W // 2, 2, C),
        (0, 2, 4, 1, 3, 5)).reshape(B, 4 * NP, C).astype(jnp.bfloat16)   # (B,4*N/4,C)

    wf_t = jnp.transpose(w_f).astype(jnp.bfloat16)   # (C, C/8)
    wh_t = jnp.transpose(w_h).astype(jnp.bfloat16)   # (C, C/8)
    wg_t = jnp.transpose(w_g).astype(jnp.bfloat16)   # (C, C/2)
    wo_t = jnp.transpose(w_o).astype(jnp.bfloat16)   # (C/2, C)
    gamma1 = jnp.reshape(gamma, (1,)).astype(jnp.float32)

    # VMEM budget: double-buffered tiles + weights + pooled-KV scratch + score temps.
    est = (2 * TQ * C * 4                    # x query tile (f32, double-buffered)
           + 2 * N * C * 2                   # pooling-layout x (bf16)
           + 2 * TQ * C * 4                  # output tile
           + 4 * (2 * C * Cf + 2 * C * Cg)   # weights (bf16, double-buffered)
           + NP * (Cf + Cg) * 2              # pooled K/V scratch
           + 4 * N * (Cf + Cg)               # stacked projection temporaries (f32)
           + 4 * TQ * NP * 4                 # score / exp temporaries
           + 4 * TQ * C * 4)                 # theta / attn_g / o temporaries
    vmem_limit = min(128 * 1024 * 1024, max(32 * 1024 * 1024, int(1.5 * est)))

    out_tok = pl.pallas_call(
        _attention_kernel,
        out_shape=jax.ShapeDtypeStruct((B, N, C), jnp.float32),
        grid=(B, num_q),
        in_specs=[
            pl.BlockSpec((None, TQ, C), lambda b, q: (b, q, 0)),        # x query tile
            pl.BlockSpec((None, 4 * NP, C), lambda b, q: (b, 0, 0)),    # pool layout (per batch)
            pl.BlockSpec((C, Cf), lambda b, q: (0, 0)),                 # W_f^T
            pl.BlockSpec((C, Cf), lambda b, q: (0, 0)),                 # W_h^T
            pl.BlockSpec((C, Cg), lambda b, q: (0, 0)),                 # W_g^T
            pl.BlockSpec((Cg, C), lambda b, q: (0, 0)),                 # W_o^T
            pl.BlockSpec(memory_space=pltpu.MemorySpace.SMEM),          # gamma scalar
        ],
        out_specs=pl.BlockSpec((None, TQ, C), lambda b, q: (b, q, 0)),
        scratch_shapes=[
            pltpu.VMEM((NP, Cf), jnp.bfloat16),   # pooled keys   (cached per batch)
            pltpu.VMEM((NP, Cg), jnp.bfloat16),   # pooled values (cached per batch)
        ],
        compiler_params=pltpu.CompilerParams(
            dimension_semantics=("parallel", "arbitrary"),
            vmem_limit_bytes=vmem_limit,
        ),
    )(x_tok, x_pool, wf_t, wh_t, wg_t, wo_t, gamma1)

    return jnp.transpose(out_tok, (0, 2, 1)).reshape(B, C, H, W)


def spectral_normalize(w, eps=1e-12):
    # specNorm_conv2d: weight / largest singular value (parameter preprocessing,
    # done once in plain JAX outside the kernel).
    sigma = jnp.linalg.svd(w, compute_uv=False)[0]
    return w / jnp.maximum(sigma, eps)


def reference_forward(x, w_f, w_g, w_h, w_o, gamma):
    # Pure-JAX NCHW reference mirroring the (intended) PyTorch forward.
    B, C, H, W = x.shape
    N = H * W
    xf = x.reshape(B, C, N)
    theta = jnp.einsum('fc,bcn->bfn', w_f, xf, precision=HIGH)
    phi = jnp.einsum('fc,bcn->bfn', w_h, xf, precision=HIGH).reshape(B, -1, H, W)
    gg = jnp.einsum('gc,bcn->bgn', w_g, xf, precision=HIGH).reshape(B, -1, H, W)

    def pool(t):
        b, c, h, w = t.shape
        t = t.reshape(b, c, h // 2, 2, w // 2, 2)
        return jnp.max(t, axis=(3, 5)).reshape(b, c, (h // 2) * (w // 2))

    phi_p = pool(phi)
    g_p = pool(gg)
    attn = jax.nn.softmax(
        jnp.einsum('bfn,bfm->bnm', theta, phi_p, precision=HIGH), axis=-1)
    attn_g = jnp.einsum('bgm,bnm->bgn', g_p, attn,
                        precision=HIGH).reshape(B, -1, H, W)
    o = jnp.einsum('cg,bghw->bchw', w_o, attn_g, precision=HIGH)
    return x + gamma * o


if __name__ == "__main__":
    B, C, H, W = 2, 32, 8, 8          # in_channels must be divisible by 8
    key = jax.random.PRNGKey(0)
    kx, kf, kg, kh, ko = jax.random.split(key, 5)

    x = jax.random.normal(kx, (B, C, H, W), dtype=jnp.float32)
    w_f = spectral_normalize(jax.random.normal(kf, (C // 8, C), jnp.float32))
    w_g = spectral_normalize(jax.random.normal(kg, (C // 2, C), jnp.float32))
    w_h = spectral_normalize(jax.random.normal(kh, (C // 8, C), jnp.float32))
    w_o = spectral_normalize(jax.random.normal(ko, (C, C // 2), jnp.float32))
    # The PyTorch module initializes gamma to 0 (output == input); use a nonzero
    # deterministic value so the attention path is actually exercised.
    gamma = jnp.float32(0.5)

    out = jax.block_until_ready(attention_block(x, w_f, w_g, w_h, w_o, gamma))
    ref = reference_forward(x, w_f, w_g, w_h, w_o, gamma)

    assert out.shape == x.shape and out.dtype == jnp.float32
    max_err = float(jnp.max(jnp.abs(out - ref)))
    # Kernel uses bf16-in / f32-accumulate MXU matmuls -> tolerance sized for bf16.
    assert jnp.allclose(out, ref, rtol=3e-2, atol=3e-2), f"max_err={max_err}"
    print("KERNEL_OK")
</pallas_src>

<mosaic_0001>
module attributes {stable_mosaic.version = 11 : i64} {
  func.func @_attention_kernel(%arg0: i32, %arg1: i32, %arg2: memref<1x64x32xf32, #tpu.memory_space<vmem>>, %arg3: memref<1x64x32xbf16, #tpu.memory_space<vmem>>, %arg4: memref<32x4xbf16, #tpu.memory_space<vmem>>, %arg5: memref<32x4xbf16, #tpu.memory_space<vmem>>, %arg6: memref<32x16xbf16, #tpu.memory_space<vmem>>, %arg7: memref<16x32xbf16, #tpu.memory_space<vmem>>, %arg8: memref<1xf32, #tpu.memory_space<smem>>, %arg9: memref<1x64x32xf32, #tpu.memory_space<vmem>>, %arg10: memref<16x4xbf16, #tpu.memory_space<vmem>>, %arg11: memref<16x16xbf16, #tpu.memory_space<vmem>>) attributes {dimension_semantics = [#tpu.dimension_semantics<parallel>, #tpu.dimension_semantics<arbitrary>], iteration_bounds = array<i64: 2, 1>, scalar_prefetch = 0 : i64, scratch_operands = 2 : i64, tpu.core_type = #tpu.core_type<tc>, window_params = [{transform_indices = @transform_0, window_bounds = array<i64: 1, 64, 32>}, {transform_indices = @transform_1, window_bounds = array<i64: 1, 64, 32>}, {pipeline_mode = #tpu.pipeline_mode<synchronous>, transform_indices = @transform_2, window_bounds = array<i64: 32, 4>}, {pipeline_mode = #tpu.pipeline_mode<synchronous>, transform_indices = @transform_3, window_bounds = array<i64: 32, 4>}, {pipeline_mode = #tpu.pipeline_mode<synchronous>, transform_indices = @transform_4, window_bounds = array<i64: 32, 16>}, {pipeline_mode = #tpu.pipeline_mode<synchronous>, transform_indices = @transform_5, window_bounds = array<i64: 16, 32>}, {transform_indices = @transform_6, window_bounds = array<i64: 1>}, {transform_indices = @transform_7, window_bounds = array<i64: 1, 64, 32>}]} {
    %c0_i32 = arith.constant 0 : i32
    %0 = arith.cmpi eq, %arg1, %c0_i32 : i32
    %1 = arith.extui %0 : i1 to i32
    %c0_i32_0 = arith.constant 0 : i32
    %2 = arith.cmpi ne, %1, %c0_i32_0 : i32
    scf.if %2 {
      %c0_20 = arith.constant 0 : index
      %c0_21 = arith.constant 0 : index
      %c0_22 = arith.constant 0 : index
      %34 = vector.load %arg3[%c0_20, %c0_21, %c0_22] : memref<1x64x32xbf16, #tpu.memory_space<vmem>>, vector<1x64x32xbf16>
      %35 = vector.shape_cast %34 : vector<1x64x32xbf16> to vector<64x32xbf16>
      %c0_23 = arith.constant 0 : index
      %c0_24 = arith.constant 0 : index
      %36 = vector.load %arg5[%c0_23, %c0_24] : memref<32x4xbf16, #tpu.memory_space<vmem>>, vector<32x4xbf16>
      %cst_25 = arith.constant dense<0.000000e+00> : vector<64x4xf32>
      %37 = tpu.matmul %35, %36, %cst_25 {dimension_numbers = #tpu.dot_dimension_numbers<[1], [0], [0], [1], [0, 0, 1, 1], [], []>} : vector<64x32xbf16>, vector<32x4xbf16>, vector<64x4xf32> -> vector<64x4xf32>
      %c0_26 = arith.constant 0 : index
      %c0_27 = arith.constant 0 : index
      %38 = vector.load %arg6[%c0_26, %c0_27] : memref<32x16xbf16, #tpu.memory_space<vmem>>, vector<32x16xbf16>
      %cst_28 = arith.constant dense<0.000000e+00> : vector<64x16xf32>
      %39 = tpu.matmul %35, %38, %cst_28 {dimension_numbers = #tpu.dot_dimension_numbers<[1], [0], [0], [1], [0, 0, 1, 1], [], []>} : vector<64x32xbf16>, vector<32x16xbf16>, vector<64x16xf32> -> vector<64x16xf32>
      %40 = vector.shape_cast %37 : vector<64x4xf32> to vector<4x16x4xf32>
      %cst_29 = arith.constant dense<0xFF800000> : vector<16x4xf32>
      %41 = vector.multi_reduction <maximumf>, %40, %cst_29 [0] : vector<4x16x4xf32> to vector<16x4xf32>
      %42 = vector.shape_cast %39 : vector<64x16xf32> to vector<4x16x16xf32>
      %cst_30 = arith.constant dense<0xFF800000> : vector<16x16xf32>
      %43 = vector.multi_reduction <maximumf>, %42, %cst_30 [0] : vector<4x16x16xf32> to vector<16x16xf32>
      %44 = arith.truncf %41 : vector<16x4xf32> to vector<16x4xbf16>
      %c0_31 = arith.constant 0 : index
      %c0_32 = arith.constant 0 : index
      %45 = vector.load %arg10[%c0_31, %c0_32] : memref<16x4xbf16, #tpu.memory_space<vmem>>, vector<16x4xbf16>
      tpu.vector_store %arg10[%c0_31, %c0_32], %44 {strides = array<i32>} : memref<16x4xbf16, #tpu.memory_space<vmem>>, vector<16x4xbf16>,
      %46 = arith.truncf %43 : vector<16x16xf32> to vector<16x16xbf16>
      %c0_33 = arith.constant 0 : index
      %c0_34 = arith.constant 0 : index
      %47 = vector.load %arg11[%c0_33, %c0_34] : memref<16x16xbf16, #tpu.memory_space<vmem>>, vector<16x16xbf16>
      tpu.vector_store %arg11[%c0_33, %c0_34], %46 {strides = array<i32>} : memref<16x16xbf16, #tpu.memory_space<vmem>>, vector<16x16xbf16>,
    } else {
    }
    %c0 = arith.constant 0 : index
    %c0_1 = arith.constant 0 : index
    %c0_2 = arith.constant 0 : index
    %3 = vector.load %arg2[%c0, %c0_1, %c0_2] : memref<1x64x32xf32, #tpu.memory_space<vmem>>, vector<1x64x32xf32>
    %4 = vector.shape_cast %3 : vector<1x64x32xf32> to vector<64x32xf32>
    %5 = arith.truncf %4 : vector<64x32xf32> to vector<64x32xbf16>
    %c0_3 = arith.constant 0 : index
    %c0_4 = arith.constant 0 : index
    %6 = vector.load %arg4[%c0_3, %c0_4] : memref<32x4xbf16, #tpu.memory_space<vmem>>, vector<32x4xbf16>
    %cst = arith.constant dense<0.000000e+00> : vector<64x4xf32>
    %7 = tpu.matmul %5, %6, %cst {dimension_numbers = #tpu.dot_dimension_numbers<[1], [0], [0], [1], [0, 0, 1, 1], [], []>} : vector<64x32xbf16>, vector<32x4xbf16>, vector<64x4xf32> -> vector<64x4xf32>
    %8 = arith.truncf %7 : vector<64x4xf32> to vector<64x4xbf16>
    %c0_5 = arith.constant 0 : index
    %c0_6 = arith.constant 0 : index
    %9 = vector.load %arg10[%c0_5, %c0_6] : memref<16x4xbf16, #tpu.memory_space<vmem>>, vector<16x4xbf16>
    %cst_7 = arith.constant dense<0.000000e+00> : vector<64x16xf32>
    %10 = tpu.matmul %8, %9, %cst_7 {dimension_numbers = #tpu.dot_dimension_numbers<[1], [1], [0], [0], [0, 0, 1, 0], [], []>} : vector<64x4xbf16>, vector<16x4xbf16>, vector<64x16xf32> -> vector<64x16xf32>
    %cst_8 = arith.constant dense<0xFF800000> : vector<64xf32>
    %11 = vector.multi_reduction <maximumf>, %10, %cst_8 [1] : vector<64x16xf32> to vector<64xf32>
    %12 = vector.shape_cast %11 : vector<64xf32> to vector<64x1xf32>
    %13 = vector.broadcast %12 : vector<64x1xf32> to vector<64x16xf32>
    %14 = arith.subf %10, %13 : vector<64x16xf32>
    %15 = math.exp %14 : vector<64x16xf32>
    %cst_9 = arith.constant dense<0.000000e+00> : vector<64xf32>
    %16 = vector.multi_reduction <add>, %15, %cst_9 [1] : vector<64x16xf32> to vector<64xf32>
    %17 = vector.shape_cast %16 : vector<64xf32> to vector<64x1xf32>
    %18 = arith.truncf %15 : vector<64x16xf32> to vector<64x16xbf16>
    %c0_10 = arith.constant 0 : index
    %c0_11 = arith.constant 0 : index
    %19 = vector.load %arg11[%c0_10, %c0_11] : memref<16x16xbf16, #tpu.memory_space<vmem>>, vector<16x16xbf16>
    %cst_12 = arith.constant dense<0.000000e+00> : vector<64x16xf32>
    %20 = tpu.matmul %18, %19, %cst_12 {dimension_numbers = #tpu.dot_dimension_numbers<[1], [0], [0], [1], [0, 0, 1, 1], [], []>} : vector<64x16xbf16>, vector<16x16xbf16>, vector<64x16xf32> -> vector<64x16xf32>
    %21 = tpu.reciprocal %17 {approx = true} : vector<64x1xf32> -> vector<64x1xf32>
    %22 = vector.broadcast %21 : vector<64x1xf32> to vector<64x16xf32>
    %23 = arith.mulf %20, %22 : vector<64x16xf32>
    %24 = arith.truncf %23 : vector<64x16xf32> to vector<64x16xbf16>
    %c0_13 = arith.constant 0 : index
    %c0_14 = arith.constant 0 : index
    %25 = vector.load %arg7[%c0_13, %c0_14] : memref<16x32xbf16, #tpu.memory_space<vmem>>, vector<16x32xbf16>
    %cst_15 = arith.constant dense<0.000000e+00> : vector<64x32xf32>
    %26 = tpu.matmul %24, %25, %cst_15 {dimension_numbers = #tpu.dot_dimension_numbers<[1], [0], [0], [1], [0, 0, 1, 1], [], []>} : vector<64x16xbf16>, vector<16x32xbf16>, vector<64x32xf32> -> vector<64x32xf32>
    %c0_16 = arith.constant 0 : index
    %27 = memref.load %arg8[%c0_16] : memref<1xf32, #tpu.memory_space<smem>>
    %28 = vector.broadcast %27 : f32 to vector<64x32xf32>
    %29 = arith.mulf %28, %26 : vector<64x32xf32>
    %30 = arith.addf %4, %29 : vector<64x32xf32>
    %c0_17 = arith.constant 0 : index
    %c0_18 = arith.constant 0 : index
    %c0_19 = arith.constant 0 : index
    %31 = vector.load %arg9[%c0_17, %c0_18, %c0_19] : memref<1x64x32xf32, #tpu.memory_space<vmem>>, vector<1x64x32xf32>
    %32 = vector.shape_cast %31 : vector<1x64x32xf32> to vector<64x32xf32>
    %33 = vector.shape_cast %30 : vector<64x32xf32> to vector<1x64x32xf32>
    tpu.vector_store %arg9[%c0_17, %c0_18, %c0_19], %33 {strides = array<i32>} : memref<1x64x32xf32, #tpu.memory_space<vmem>>, vector<1x64x32xf32>,
    return
  }
  func.func @transform_0(%arg0: i32, %arg1: i32) -> (i32, i32, i32) {
    %c0_i32 = arith.constant 0 : i32
    %c0_i32_0 = arith.constant 0 : i32
    return %arg0, %arg1, %c0_i32 : i32, i32, i32
  }
  func.func @transform_1(%arg0: i32, %arg1: i32) -> (i32, i32, i32) {
    %c0_i32 = arith.constant 0 : i32
    %c0_i32_0 = arith.constant 0 : i32
    %c0_i32_1 = arith.constant 0 : i32
    return %arg0, %c0_i32, %c0_i32_0 : i32, i32, i32
  }
  func.func @transform_2(%arg0: i32, %arg1: i32) -> (i32, i32) {
    %c0_i32 = arith.constant 0 : i32
    %c0_i32_0 = arith.constant 0 : i32
    %c0_i32_1 = arith.constant 0 : i32
    return %c0_i32, %c0_i32_0 : i32, i32
  }
  func.func @transform_3(%arg0: i32, %arg1: i32) -> (i32, i32) {
    %c0_i32 = arith.constant 0 : i32
    %c0_i32_0 = arith.constant 0 : i32
    %c0_i32_1 = arith.constant 0 : i32
    return %c0_i32, %c0_i32_0 : i32, i32
  }
  func.func @transform_4(%arg0: i32, %arg1: i32) -> (i32, i32) {
    %c0_i32 = arith.constant 0 : i32
    %c0_i32_0 = arith.constant 0 : i32
    %c0_i32_1 = arith.constant 0 : i32
    return %c0_i32, %c0_i32_0 : i32, i32
  }
  func.func @transform_5(%arg0: i32, %arg1: i32) -> (i32, i32) {
    %c0_i32 = arith.constant 0 : i32
    %c0_i32_0 = arith.constant 0 : i32
    %c0_i32_1 = arith.constant 0 : i32
    return %c0_i32, %c0_i32_0 : i32, i32
  }
  func.func @transform_6(%arg0: i32, %arg1: i32) -> i32 {
    %c0_i32 = arith.constant 0 : i32
    %c0_i32_0 = arith.constant 0 : i32
    return %c0_i32 : i32
  }
  func.func @transform_7(%arg0: i32, %arg1: i32) -> (i32, i32, i32) {
    %c0_i32 = arith.constant 0 : i32
    %c0_i32_0 = arith.constant 0 : i32
    return %arg0, %arg1, %c0_i32 : i32, i32, i32
  }
}

</mosaic_0001>

<bundles_post_ra>
// kernel: tpu_custom_call.1
= control target key start
LH: loop header
LB: loop body
LE: loop exit
PB: predicated region body
PF: predicated region fallthrough
CT: control target
= control target key end

     0   :  { %s1486_s26 = smov 0   ;;  %s1488_s27 = smov 0   ;;  %s1649_s0 = inlined_call_operand.vmem [shape: f32[2,64,32], index: 0, kind: input, shape index: {}]   ;;  %s1650_s1 = inlined_call_operand.vmem [shape: bf16[2,64,32], index: 1, kind: input, shape index: {}]   ;;  %s1651_s2 = inlined_call_operand.vmem [shape: bf16[32,4], index: 2, kind: input, shape index: {}]   ;;  %s1652_s3 = inlined_call_operand.vmem [shape: bf16[32,4], index: 3, kind: input, shape index: {}]   ;;  %s1653_s4 = inlined_call_operand.vmem [shape: bf16[32,16], index: 4, kind: input, shape index: {}]   ;;  %s1654_s5 = inlined_call_operand.vmem [shape: bf16[16,32], index: 5, kind: input, shape index: {}]   ;;  %s1655_s6 = inlined_call_operand.<no memory space> [shape: f32[1], index: 6, kind: input, shape index: {}]   ;;  %s1656_s7 = inlined_call_operand.vmem [shape: f32[2,64,32], index: 7, kind: output, shape index: {}]  }
   0x1   :  { %12 = sst [smem:[#allocation4]] %s1655_s6  ;;  %s1490_s28 = smov 0  }
   0x2 LB: > { %s30_s6 = sadd.s32 1, %s1437_s27  ;;  %p1193_p0 = scmp.ge.s32.totalorder %s1441_s28, 1  ;;  %s1441_s28 = sphi %s1490_s28, %s18_s28   ;;  %s1437_s27 = sphi %s1488_s27, %s1658_s27   ;;  %s1433_s26 = sphi %s1486_s26, %s1657_s26  }
   0x3   : > { %p32_p1 = scmp.ge.s32.totalorder %s30_s6, 2  ;;  %p269_p2 = scmp.lt.s32.totalorder %s1441_s28, 3 }
   0x5   : > { %s1660_s6 = smov (%p32_p1, %s30_s6), 0  ;;  %p270_p3 = pnand %p1193_p0, %p269_p2 }
   0x6   : > { %p315_p4 = scmp.lt.s32.totalorder (!%p270_p3), %s1433_s26, 1  ;;  %s1064_s8 = sld [smem:[#allocation4]] (!%p270_p3) }
   0x7   : > { %273 = sbr.rel (%p270_p3) target bundleno = 1029 (0x405), region = 48 }
   0xc   : > { %v1374_v0 = vld [vmem:[%s1652_s3 + $0x8] sm:$0xff]   ;;  %v1375_v1 = vld [vmem:[%s1652_s3] sm:$0xff]   ;;  %s1662_s26 = smov (!%p315_p4, %s1433_s26), 1  ;;  %vm388_vm0 = vcmask 261120   ;;  %vm547_vm1 = vcmask 31744   ;;  %vm585_vm2 = vcmask 27648  }
   0xd   : > { %1283 = vmatprep.subr.bf16.mxu0 %v1374_v0  ;;  %s1244_s10 = sshll.u32 %s1662_s26, 5  ;;  %v1380_v2 = vld [vmem:[%s1651_s2 + $0x8] sm:$0xff]   ;;  %s1243_s16 = sshll.u32 %s1662_s26, 6  ;;  %v1381_v4 = vld [vmem:[%s1651_s2] sm:$0xff]   ;;  %vm562_vm3 = vcmask 130048   ;;  %vm596_vm4 = vcmask 125952  }
   0xe   : > { %1284 = vmatpush3.bf16.msra.mxu0 %v1374_v0  ;;  %s328_s15 = scalar_lea.vmem %s1650_s1, %s1244_s10  ;;  %s322_s21 = scalar_lea.vmem %s1649_s0, %s1243_s16  ;;  %v1382_v20 = vld [vmem:[%s1653_s4 + $0x8] sm:$0xff]   ;;  %v1383_v21 = vld [vmem:[%s1653_s4] sm:$0xff]  }
   0xf   : > { %1285 = vmatprep.subr.bf16.mxu0 %v1375_v1  ;;  %v1376_v3 = vld [vmem:[%s328_s15] sm:$0xff]   ;;  %v1377_v5 = vld [vmem:[%s328_s15 + $0x8] sm:$0xff]   ;;  %v1378_v6 = vld [vmem:[%s328_s15 + $0x10] sm:$0xff]   ;;  %1295 = vmatprep.subr.bf16.mxu1 %v1382_v20  ;;  %s337_s11 = scalar_lea.vmem %s1656_s7, %s1243_s16 }
  0x10   : > { %1287 = vmatprep.mubr.msk.bf16.mxu0 %vm388_vm0, %v1376_v3  ;;  %1299 = vmatprep.mubr.msk.bf16.mxu1 %vm388_vm0, %v1376_v3  ;;  %v1532_v7 = vld [vmem:[%s322_s21] sm:$0xff]  ;;  %v1534_v8 = vld [vmem:[%s322_s21 + $0x8] sm:$0xff]  ;;  %v1379_v9 = vld [vmem:[%s328_s15 + $0x18] sm:$0xff]  }
  0x11   : > { %v607_v10 = vpack.c.bf16 %v1534_v8, %v1532_v7  ;;  %v1540_v11 = vld [vmem:[%s322_s21 + $0x10] sm:$0xff]  ;;  %v1542_v12 = vld [vmem:[%s322_s21 + $0x18] sm:$0xff]  ;;  %v1544_v13 = vld [vmem:[%s322_s21 + $0x20] sm:$0xff]  ;;  %1296 = vmatpush3.bf16.msra.mxu1 %v1382_v20 }
  0x12   : > { %1286 = vmatpush3.bf16.msra.mxu0 %v1375_v1  ;;  %v1546_v14 = vld [vmem:[%s322_s21 + $0x28] sm:$0xff]  ;;  %v608_v15 = vpack.c.bf16 %v1542_v12, %v1540_v11  ;;  %v1554_v17 = vld [vmem:[%s322_s21 + $0x30] sm:$0xff]  ;;  %v1556_v18 = vld [vmem:[%s322_s21 + $0x38] sm:$0xff]  ;;  %1297 = vmatprep.subr.bf16.mxu1 %v1383_v21 }
  0x13   : > { %1307 = vmatprep.subr.bf16.mxu0 %v1380_v2  ;;  %v609_v16 = vpack.c.bf16 %v1546_v14, %v1544_v13  ;;  %v610_v19 = vpack.c.bf16 %v1556_v18, %v1554_v17 }
  0x15   : > { %1288 = vmatmul.mubr.msk.bf16.vlgmr.msra.gmra.mxu0 %vm388_vm0, %v1377_v5  ;;  %1298 = vmatpush3.bf16.msra.mxu1 %v1383_v21 }
  0x16   : > { %1291 = vmatprep.mubr.msk.bf16.mxu0 %vm388_vm0, %v1378_v6  ;;  %1308 = vmatpush3.bf16.msra.mxu0 %v1380_v2 }
  0x17   : > { %1309 = vmatprep.subr.bf16.mxu0 %v1381_v4 }
  0x18   : > { %1300 = vmatmul.mubr.msk.bf16.vlgmr.msra.gmra.mxu1 %vm388_vm0, %v1377_v5 }
  0x19   : > { %1303 = vmatprep.mubr.msk.bf16.mxu1 %vm388_vm0, %v1378_v6 }
  0x1a   : > { %1310 = vmatpush3.bf16.msra.mxu0 %v1381_v4 }
  0x1d   : > { %1292 = vmatmul.mubr.msk.bf16.gmra.mxu0 %vm388_vm0, %v1379_v9 }
  0x1e   : > { %1311 = vmatprep.mubr.msk.bf16.mxu0 %vm388_vm0, %v607_v10 }
  0x20   : > { %1304 = vmatmul.mubr.msk.bf16.gmra.mxu1 %vm388_vm0, %v1379_v9 }
  0x25   : > { %1312 = vmatmul.mubr.msk.bf16.vlgmr.msra.gmra.mxu0 %vm388_vm0, %v608_v15 }
  0x26   : > { %1315 = vmatprep.mubr.msk.bf16.mxu0 %vm388_vm0, %v609_v16 }
  0x2d   : > { %1316 = vmatmul.mubr.msk.bf16.gmra.mxu0 %vm388_vm0, %v610_v19 }
  0xd5   : > { %v1289_v22 = vpop.f32.mrf.mxu0 }
  0xd6   : > { %v549_v29 = vsel %vm547_vm1, %v1289_v22, -inf }
  0xd7   : > { %v435_v23 = vpop.f32.mrf.mxu0 }
  0xd8   : > { %v548_v30 = vsel %vm547_vm1, %v435_v23, -inf  ;;  %v1301_v60 = vpop.f32.mrf.mxu1 }
  0xd9   : > { %v1290_v24 = vpop.f32.mrf.mxu0  ;;  %v564_v0 = vsel %vm562_vm3, %v1301_v60, -inf }
  0xda   : > { %v556_v38 = vsel %vm547_vm1, %v1290_v24, -inf  ;;  %v516_v61 = vpop.f32.mrf.mxu1 }
  0xdb   : > { %v438_v25 = vpop.f32.mrf.mxu0  ;;  %v563_v2 = vsel %vm562_vm3, %v516_v61, -inf }
  0xdc   : > { %v555_v39 = vsel %vm547_vm1, %v438_v25, -inf  ;;  %v1302_v62 = vpop.f32.mrf.mxu1 }
  0xdd   : > { %v1293_v26 = vpop.f32.mrf.mxu0  ;;  %v571_v6 = vsel %vm562_vm3, %v1302_v62, -inf }
  0xde   : > { %v552_v27 = vsel %vm547_vm1, %v1293_v26, -inf  ;;  %v519_v63 = vpop.f32.mrf.mxu1 }
  0xdf   : > { %v451_v28 = vpop.f32.mrf.mxu0  ;;  %v553_v32 = vmax.f32 %v549_v29, %v552_v27  ;;  %v570_v16 = vsel %vm562_vm3, %v519_v63, -inf }
  0xe0   : > { %v550_v31 = vsel %vm547_vm1, %v451_v28, -inf  ;;  %v1305_v1 = vpop.f32.mrf.mxu1 }
  0xe1   : > { %v551_v33 = vmax.f32 %v548_v30, %v550_v31  ;;  %v1294_v34 = vpop.f32.mrf.mxu0  ;;  %v567_v3 = vsel %vm562_vm3, %v1305_v1, -inf }
  0xe2   : > { %v559_v35 = vsel %vm547_vm1, %v1294_v34, -inf  ;;  %v568_v4 = vmax.f32 %v564_v0, %v567_v3  ;;  %v532_v5 = vpop.f32.mrf.mxu1 }
  0xe3   : > { %v554_v36 = vmax.f32 %v551_v33, %v553_v32  ;;  %v454_v37 = vpop.f32.mrf.mxu0  ;;  %v560_v42 = vmax.f32 %v556_v38, %v559_v35  ;;  %v565_v9 = vsel %vm562_vm3, %v532_v5, -inf }
  0xe4   : > { %v557_v40 = vsel %vm547_vm1, %v454_v37, -inf  ;;  %v566_v10 = vmax.f32 %v563_v2, %v565_v9  ;;  %v1306_v15 = vpop.f32.mrf.mxu1 }
  0xe5   : > { %v1246_v41 = vpack.c.bf16 %v554_v36, %v554_v36  ;;  %v558_v43 = vmax.f32 %v555_v39, %v557_v40  ;;  %v1313_v44 = vpop.f32.mrf.mxu0  ;;  %v574_v19 = vsel %vm562_vm3, %v1306_v15, -inf }
  0xe6   : > { %v569_v20 = vmax.f32 %v566_v10, %v568_v4  ;;  %v575_v21 = vmax.f32 %v571_v6, %v574_v19  ;;  %v535_v22 = vpop.f32.mrf.mxu1 }
  0xe7   : > { %586 = vst.msk [vmem:[#allocation2] sm:$0xf] %vm585_vm2, %v1246_v41  ;;  %v561_v45 = vmax.f32 %v558_v43, %v560_v42  ;;  %v674_v46 = vpop.f32.mrf.mxu0  ;;  %v572_v23 = vsel %vm562_vm3, %v535_v22, -inf }
  0xe8   : > { %v1248_v24 = vpack.c.bf16 %v569_v20, %v569_v20  ;;  %v573_v25 = vmax.f32 %v570_v16, %v572_v23 }
  0xe9   : > { %v1247_v47 = vpack.c.bf16 %v561_v45, %v561_v45  ;;  %v1314_v48 = vpop.f32.mrf.mxu0 }
  0xea   : > { %v706_v58 = vpack.c.bf16 %v1314_v48, %v1313_v44  ;;  %597 = vst.msk [vmem:[#allocation3] sm:$0xf] %vm596_vm4, %v1248_v24  ;;  %v576_v26 = vmax.f32 %v573_v25, %v575_v21 }
  0xeb   : > { %587 = vst.msk [vmem:[#allocation2 + $0x4] sm:$0xf] %vm585_vm2, %v1247_v47  ;;  %v677_v49 = vpop.f32.mrf.mxu0 }
  0xec   : > { %v705_v50 = vpack.c.bf16 %v677_v49, %v674_v46  ;;  %v1249_v27 = vpack.c.bf16 %v576_v26, %v576_v26 }
  0xed   : > { %v1317_v51 = vpop.f32.mrf.mxu0 }
  0xee   : > { %1321 = vmatprep.mubr.msk.bf16.mxu1 %vm547_vm1, %v705_v50  ;;  %598 = vst.msk [vmem:[#allocation3 + $0x4] sm:$0xf] %vm596_vm4, %v1249_v27 }
  0xef   : > { %v690_v52 = vpop.f32.mrf.mxu0 }
  0xf1   : > { %v1318_v54 = vpop.f32.mrf.mxu0 }
  0xf2   : > { %v1384_v53 = vld [vmem:[#allocation2] sm:$0xff]   ;;  %v708_v59 = vpack.c.bf16 %v1318_v54, %v1317_v51 }
  0xf3   : > { %1349 = vmatprep.subr.msk.bf16.mxu1 %vm547_vm1, %v1384_v53  ;;  %v730_v55 = vsel %vm547_vm1, %v1384_v53, 0  ;;  %v693_v56 = vpop.f32.mrf.mxu0 }
  0xf4   : > { %1320 = vmatpush3.bf16.xpose.msra.mxu1 %v730_v55  ;;  %v707_v57 = vpack.c.bf16 %v693_v56, %v690_v52 }
  0xf5   : > { %v1385_v28 = vld [vmem:[#allocation3] sm:$0xff]  }
  0xf6   : > { %1329 = vmatprep.subr.bf16.mxu0 %v1385_v28 }
  0xf7   : > { %1330 = vmatpush3.bf16.msra.mxu0 %v1385_v28 }
  0xfb   : > { %1322 = vmatmul.mubr.msk.bf16.vlgmr.msra.gmra.mxu1 %vm547_vm1, %v706_v58 }
  0xfc   : > { %1325 = vmatprep.mubr.msk.bf16.mxu1 %vm547_vm1, %v707_v57 }
 0x103   : > { %1326 = vmatmul.mubr.msk.bf16.gmra.mxu1 %vm547_vm1, %v708_v59 }
 0x1bb   : > { %v1323_v29 = vpop.f32.mrf.mxu1 }
 0x1bc   : > { %v804_v30 = vsel %vm562_vm3, %v1323_v29, -inf }
 0x1bd   : > { %805 = vmax.xlane.f32.xlu1 %v804_v30  ;;  %v766_v31 = vpop.f32.mrf.mxu1 }
 0x1be   : > { %v798_v32 = vsel %vm562_vm3, %v766_v31, -inf }
 0x1bf   : > { %799 = vmax.xlane.f32.xlu0 %v798_v32  ;;  %v1324_v33 = vpop.f32.mrf.mxu1 }
 0x1c0   : > { %v807_v34 = vsel %vm562_vm3, %v1324_v33, -inf }
 0x1c1   : > { %808 = vmax.xlane.f32.xlu1 %v807_v34  ;;  %v769_v35 = vpop.f32.mrf.mxu1 }
 0x1c2   : > { %v801_v36 = vsel %vm562_vm3, %v769_v35, -inf }
 0x1c3   : > { %802 = vmax.xlane.f32.xlu0 %v801_v36  ;;  %v1327_v37 = vpop.f32.mrf.mxu1 }
 0x1c4   : > { %v816_v42 = vsel %vm562_vm3, %v1327_v37, -inf }
 0x1c5   : > { %v782_v38 = vpop.f32.mrf.mxu1 }
 0x1c6   : > { %v810_v39 = vsel %vm562_vm3, %v782_v38, -inf }
 0x1c7   : > { %811 = vmax.xlane.f32.xlu0 %v810_v39  ;;  %v1328_v40 = vpop.f32.mrf.mxu1 }
 0x1c8   : > { %v819_v44 = vsel %vm562_vm3, %v1328_v40, -inf }
 0x1c9   : > { %v785_v41 = vpop.f32.mrf.mxu1 }
 0x1ca   : > { %v813_v43 = vsel %vm562_vm3, %v785_v41, -inf }
 0x1cb   : > { %817 = vmax.xlane.f32.xlu0 %v816_v42  ;;  %814 = vmax.xlane.f32.xlu1 %v813_v43 }
 0x1cf   : > { %820 = vmax.xlane.f32.xlu1 %v819_v44 }
 0x246   : > { %v806_v45 = vpop.xlane.xlu1 %805 }
 0x247   : > { %v824_v46 = vsub.f32 %v1323_v29, %v806_v45 }
 0x248   : > { %v800_v47 = vpop.xlane.xlu0 %799 }
 0x249   : > { %v822_v48 = vsub.f32 %v766_v31, %v800_v47  ;;  %v834_v50 = vmul.f32 1.442695, %v824_v46 }
 0x24a   : > { %v809_v49 = vpop.xlane.xlu1 %808 }
 0x24b   : > { %v830_v51 = vmul.f32 1.442695, %v822_v48  ;;  %v825_v52 = vsub.f32 %v1324_v33, %v809_v49  ;;  %v1386_v33 = vld [vmem:[%s1654_s5] sm:$0xff]  }
 0x24c   : > { %v803_v53 = vpop.xlane.xlu0 %802  ;;  %1339 = vmatprep.subr.bf16.mxu1 %v1386_v33 }
 0x24d   : > { %1387 = vpow2.f32 %v830_v51  ;;  %v836_v54 = vmul.f32 1.442695, %v825_v52  ;;  %v823_v55 = vsub.f32 %v769_v35, %v803_v53  ;;  %1340 = vmatpush3.bf16.msra.mxu1 %v1386_v33 }
 0x24e   : > { %1389 = vpow2.f32 %v834_v50 }
 0x24f   : > { %v832_v56 = vmul.f32 1.442695, %v823_v55  ;;  %1391 = vpow2.f32 %v836_v54 }
 0x250   : > { %v812_v57 = vpop.xlane.xlu0 %811 }
 0x251   : > { %1393 = vpow2.f32 %v832_v56  ;;  %v826_v58 = vsub.f32 %v782_v38, %v812_v57 }
 0x253   : > { %v838_v59 = vmul.f32 1.442695, %v826_v58 }
 0x254   : > { %v818_v60 = vpop.xlane.xlu0 %817  ;;  %v815_v61 = vpop.xlane.xlu1 %814 }
 0x255   : > { %1395 = vpow2.f32 %v838_v59  ;;  %v828_v62 = vsub.f32 %v1327_v37, %v818_v60  ;;  %v827_v63 = vsub.f32 %v785_v41, %v815_v61 }
 0x257   : > { %v842_v0 = vmul.f32 1.442695, %v828_v62  ;;  %v840_v1 = vmul.f32 1.442695, %v827_v63 }
 0x258   : > { %v821_v2 = vpop.xlane.xlu1 %820 }
 0x259   : > { %1397 = vpow2.f32 %v842_v0  ;;  %v829_v3 = vsub.f32 %v1328_v40, %v821_v2 }
 0x25a   : > { %v1388_v4 = vpop.eup %1387  ;;  %1399 = vpow2.f32 %v840_v1 }
 0x25b   : > { %v844_v5 = vmul.f32 1.442695, %v829_v3  ;;  %v846_v6 = vsel %vm562_vm3, %v1388_v4, 0.0  ;;  %v1390_v9 = vpop.eup %1389 }
 0x25c   : > { %847 = vadd.xlane.f32.xlu0 %v846_v6  ;;  %v1392_v10 = vpop.eup %1391  ;;  %v852_v16 = vsel %vm562_vm3, %v1390_v9, 0.0  ;;  %v1065_v6 = vstv %s1064_s8 }
 0x25d   : > { %1401 = vpow2.f32 %v844_v5  ;;  %v871_v21 = vpack.c.bf16 %v1392_v10, %v1390_v9  ;;  %v855_v24 = vsel %vm562_vm3, %v1392_v10, 0.0 }
 0x25e   : > { %v1394_v15 = vpop.eup %1393 }
 0x25f   : > { %v849_v19 = vsel %vm562_vm3, %v1394_v15, 0.0  ;;  %v870_v20 = vpack.c.bf16 %v1394_v15, %v1388_v4 }
 0x260   : > { %853 = vadd.xlane.f32.xlu0 %v852_v16  ;;  %850 = vadd.xlane.f32.xlu1 %v849_v19 }
 0x261   : > { %1331 = vmatprep.mubr.msk.bf16.mxu0 %vm562_vm3, %v870_v20 }
 0x262   : > { %v1396_v22 = vpop.eup %1395  ;;  %1332 = vmatmul.mubr.msk.bf16.vlgmr.msra.gmra.mxu0 %vm562_vm3, %v871_v21 }
 0x263   : > { %v858_v23 = vsel %vm562_vm3, %v1396_v22, 0.0 }
 0x264   : > { %859 = vadd.xlane.f32.xlu0 %v858_v23  ;;  %856 = vadd.xlane.f32.xlu1 %v855_v24 }
 0x266   : > { %v1398_v25 = vpop.eup %1397 }
 0x267   : > { %v1400_v26 = vpop.eup %1399  ;;  %v864_v27 = vsel %vm562_vm3, %v1398_v25, 0.0 }
 0x268   : > { %865 = vadd.xlane.f32.xlu0 %v864_v27  ;;  %v861_v28 = vsel %vm562_vm3, %v1400_v26, 0.0  ;;  %v872_v29 = vpack.c.bf16 %v1400_v26, %v1396_v22 }
 0x269   : > { %862 = vadd.xlane.f32.xlu1 %v861_v28 }
 0x26a   : > { %v1402_v30 = vpop.eup %1401  ;;  %1335 = vmatprep.mubr.msk.bf16.mxu0 %vm562_vm3, %v872_v29 }
 0x26b   : > { %v867_v31 = vsel %vm562_vm3, %v1402_v30, 0.0  ;;  %v873_v32 = vpack.c.bf16 %v1402_v30, %v1398_v25 }
 0x26d   : > { %868 = vadd.xlane.f32.xlu1 %v867_v31  ;;  %1336 = vmatmul.mubr.msk.bf16.gmra.mxu0 %vm562_vm3, %v873_v32 }
 0x2e5   : > { %v848_v35 = vpop.xlane.xlu0 %847 }
 0x2e6   : > { %1403 = vrcp.f32 %v848_v35 }
 0x2e9   : > { %v851_v34 = vpop.xlane.xlu1 %850  ;;  %v854_v37 = vpop.xlane.xlu0 %853 }
 0x2ed   : > { %v857_v36 = vpop.xlane.xlu1 %856  ;;  %v860_v39 = vpop.xlane.xlu0 %859 }
 0x2ee   : > { %1405 = vrcp.f32 %v857_v36 }
 0x2ef   : > { %1407 = vrcp.f32 %v851_v34 }
 0x2f0   : > { %1409 = vrcp.f32 %v854_v37 }
 0x2f1   : > { %1411 = vrcp.f32 %v860_v39  ;;  %v866_v42 = vpop.xlane.xlu0 %865 }
 0x2f2   : > { %v863_v38 = vpop.xlane.xlu1 %862 }
 0x2f3   : > { %v1404_v44 = vpop.eup %1403 }
 0x2f6   : > { %v869_v40 = vpop.xlane.xlu1 %868 }
 0x2f7   : > { %1413 = vrcp.f32 %v869_v40 }
 0x2f8   : > { %1415 = vrcp.f32 %v863_v38 }
 0x2f9   : > { %1417 = vrcp.f32 %v866_v42 }
 0x2fb   : > { %v1406_v46 = vpop.eup %1405 }
 0x2fc   : > { %v1408_v47 = vpop.eup %1407 }
 0x2fd   : > { %v1410_v50 = vpop.eup %1409 }
 0x2fe   : > { %v1412_v58 = vpop.eup %1411 }
 0x304   : > { %v1414_v60 = vpop.eup %1413 }
 0x305   : > { %v1416_v61 = vpop.eup %1415 }
 0x306   : > { %v1418_v0 = vpop.eup %1417 }
 0x322   : > { %v1333_v41 = vpop.f32.mrf.mxu0 }
 0x323   : > { %v969_v53 = vmul.f32 %v1410_v50, %v1333_v41 }
 0x324   : > { %v928_v43 = vpop.f32.mrf.mxu0 }
 0x325   : > { %v967_v51 = vmul.f32 %v1404_v44, %v928_v43 }
 0x326   : > { %v1334_v45 = vpop.f32.mrf.mxu0 }
 0x327   : > { %v970_v48 = vmul.f32 %v1406_v46, %v1334_v45 }
 0x328   : > { %v931_v49 = vpop.f32.mrf.mxu0 }
 0x329   : > { %v968_v52 = vmul.f32 %v1408_v47, %v931_v49  ;;  %v976_v55 = vpack.c.bf16 %v970_v48, %v969_v53 }
 0x32b   : > { %v975_v54 = vpack.c.bf16 %v968_v52, %v967_v51 }
 0x32d   : > { %v1337_v56 = vpop.f32.mrf.mxu0  ;;  %1341 = vmatprep.mubr.msk.bf16.mxu1 %vm562_vm3, %v975_v54 }
 0x32e   : > { %1342 = vmatmul.mubr.msk.bf16.vlgmr.msra.gmra.mxu1 %vm562_vm3, %v976_v55  ;;  %v973_v3 = vmul.f32 %v1418_v0, %v1337_v56 }
 0x32f   : > { %v944_v57 = vpop.f32.mrf.mxu0 }
 0x330   : > { %v971_v1 = vmul.f32 %v1412_v58, %v944_v57 }
 0x331   : > { %v1338_v59 = vpop.f32.mrf.mxu0 }
 0x332   : > { %v974_v62 = vmul.f32 %v1414_v60, %v1338_v59 }
 0x333   : > { %v947_v63 = vpop.f32.mrf.mxu0 }
 0x334   : > { %v972_v2 = vmul.f32 %v1416_v61, %v947_v63  ;;  %v978_v5 = vpack.c.bf16 %v974_v62, %v973_v3 }
 0x336   : > { %v977_v4 = vpack.c.bf16 %v972_v2, %v971_v1 }
 0x338   : > { %1345 = vmatprep.mubr.msk.bf16.mxu1 %vm562_vm3, %v977_v4 }
 0x339   : > { %1346 = vmatmul.mubr.msk.bf16.gmra.mxu1 %vm562_vm3, %v978_v5 }
 0x3ee   : > { %v1343_v9 = vpop.f32.mrf.mxu1 }
 0x3ef   : > { %v1068_v10 = vmul.f32 %v1343_v9, %v1065_v6 }
 0x3f0   : > { %v1033_v15 = vpop.f32.mrf.mxu1 }
 0x3f1   : > { %v1076_v16 = vadd.f32 %v1068_v10, %v1540_v11  ;;  %v1066_v19 = vmul.f32 %v1065_v6, %v1033_v15 }
 0x3f2   : > { %v1344_v20 = vpop.f32.mrf.mxu1 }
 0x3f3   : > { %1084 = vst.msk [vmem:[%s337_s11 + $0x10] sm:$0xff] %vm388_vm0, %v1076_v16  ;;  %v1074_v21 = vadd.f32 %v1066_v19, %v1532_v7  ;;  %v1069_v22 = vmul.f32 %v1344_v20, %v1065_v6 }
 0x3f4   : > { %v1036_v23 = vpop.f32.mrf.mxu1 }
 0x3f5   : > { %1082 = vst.msk [vmem:[%s337_s11] sm:$0xff] %vm388_vm0, %v1074_v21  ;;  %v1077_v24 = vadd.f32 %v1069_v22, %v1542_v12  ;;  %v1067_v25 = vmul.f32 %v1065_v6, %v1036_v23 }
 0x3f7   : > { %1085 = vst.msk [vmem:[%s337_s11 + $0x18] sm:$0xff] %vm388_vm0, %v1077_v24  ;;  %v1075_v26 = vadd.f32 %v1067_v25, %v1534_v8 }
 0x3f9   : > { %1083 = vst.msk [vmem:[%s337_s11 + $0x8] sm:$0xff] %vm388_vm0, %v1075_v26  ;;  %v1347_v11 = vpop.f32.mrf.mxu1 }
 0x3fa   : > { %v1072_v27 = vmul.f32 %v1347_v11, %v1065_v6 }
 0x3fb   : > { %v1049_v28 = vpop.f32.mrf.mxu1 }
 0x3fc   : > { %v1080_v29 = vadd.f32 %v1072_v27, %v1554_v17  ;;  %v1070_v30 = vmul.f32 %v1065_v6, %v1049_v28 }
 0x3fd   : > { %v1348_v7 = vpop.f32.mrf.mxu1 }
 0x3fe   : > { %1088 = vst.msk [vmem:[%s337_s11 + $0x30] sm:$0xff] %vm388_vm0, %v1080_v29  ;;  %v1078_v31 = vadd.f32 %v1070_v30, %v1544_v13  ;;  %v1073_v32 = vmul.f32 %v1348_v7, %v1065_v6 }
 0x3ff   : > { %v1052_v12 = vpop.f32.mrf.mxu1 }
 0x400   : > { %1086 = vst.msk [vmem:[%s337_s11 + $0x20] sm:$0xff] %vm388_vm0, %v1078_v31  ;;  %v1081_v33 = vadd.f32 %v1073_v32, %v1556_v18  ;;  %v1071_v8 = vmul.f32 %v1065_v6, %v1052_v12 }
 0x402   : > { %1089 = vst.msk [vmem:[%s337_s11 + $0x38] sm:$0xff] %vm388_vm0, %v1081_v33  ;;  %v1079_v34 = vadd.f32 %v1071_v8, %v1546_v14 }
 0x404   : > { %1087 = vst.msk [vmem:[%s337_s11 + $0x28] sm:$0xff] %vm388_vm0, %v1079_v34 }
 0x405 PF: > { %s18_s28 = sadd.s32 1, %s1441_s28   ;;  %s1657_s26 = smov %s1437_s27 }
 0x406   : > { %p15_p5 = scmp.ge.s32.totalorder %s18_s28, 4   ;;  %s1658_s27 = smov %s1660_s6 }
 0x408   :  { %17 = sbr.rel (!%p15_p5) target bundleno = 2 (0x2), region = 85 }

</bundles_post_ra>
